<compile_context>
chip_gen: v5e
topology: v5e:2x2
jax: 0.10.0
libtpu: 0.0.40
codegen_flags: <defaults>
</compile_context>

<pallas_src>
import functools

import jax
import jax.numpy as jnp
from jax import lax
from jax.experimental import pallas as pl
from jax.experimental.pallas import tpu as pltpu

TAU = 0.1
EPS = 1e-8  # torch.nn.functional.cosine_similarity default eps


def _round_up(x, m):
    return (x + m - 1) // m * m


def _vmem_budget_bytes():
    # Per-generation VMEM budget: ~75% of per-core capacity
    # (v5e/v6e: 128 MiB -> ~96 MiB, v7x: 64 MiB -> 48 MiB).
    cap = 64 * 1024 * 1024  # conservative fallback = v7x per-core VMEM
    try:
        cap = int(pltpu.get_tpu_info().vmem_capacity_bytes)
    except Exception:
        pass
    return (3 * cap) // 4


def _gprompt_loss_kernel(emb_ref, ctr_ref, cnorm_ref, lbl_ref, out_ref, *,
                         n_total, steps_per_chunk, tau):
    # emb_ref:   (tile_n, D) native dtype   -- streamed N tile (double-buffered)
    # ctr_ref:   (C, D)      native dtype   -- resident, single-buffered
    # cnorm_ref: (C, 1)      f32            -- resident center norms ||c||
    # lbl_ref:   (1, tile_n) int32          -- streamed, lane-dense labels
    # out_ref:   (8, 128)    f32            -- this chunk's accumulator block
    p = pl.program_id(0)          # parallel chunk (TensorCore on v7x)
    i = pl.program_id(1)          # N tile within the chunk (reduction axis)
    tile_n, d = emb_ref.shape

    @pl.when(i == 0)
    def _init():
        out_ref[...] = jnp.zeros_like(out_ref)

    emb = emb_ref[...]            # (tile_n, D)
    ctr = ctr_ref[...]            # (C, D)
    cnorm = cnorm_ref[...]        # (C, 1) f32
    labels = lbl_ref[...]         # (1, tile_n) int32

    dn_t = (((1,), (1,)), ((), ()))   # contract dim 1 of both operands (a @ b.T)

    # --- MXU: class-major dot products, f32 accumulation -> (C, tile_n) ---
    dots = lax.dot_general(ctr, emb, dn_t, preferred_element_type=jnp.float32)

    # --- MXU: per-sample squared norms, lane-dense (1, tile_n).
    # bf16 hi/lo split keeps the result at f32 accuracy even if the MXU's default
    # f32 precision is a single bf16 pass.
    emb_f = emb.astype(jnp.float32)
    sq = emb_f * emb_f
    sq_hi = sq.astype(jnp.bfloat16).astype(jnp.float32)
    sq_lo = sq - sq_hi
    ones8 = jnp.ones((8, d), jnp.float32)
    sumsq8 = (lax.dot_general(ones8, sq_hi, dn_t, preferred_element_type=jnp.float32)
              + lax.dot_general(ones8, sq_lo, dn_t, preferred_element_type=jnp.float32))
    norm_e = jnp.sqrt(sumsq8[0:1, :])                               # (1, tile_n)

    # --- cosine similarity with the PyTorch product clamp, scaled by 1/tau ---
    denom = jnp.maximum(norm_e * cnorm, EPS)                        # (C, tile_n)
    sim = dots / denom * (1.0 / tau)                                # (C, tile_n)

    # --- logsumexp over classes (sublane axis) -> (1, tile_n) ---
    m = jnp.max(sim, axis=0, keepdims=True)
    lse = m + jnp.log(jnp.sum(jnp.exp(sim - m), axis=0, keepdims=True))

    # --- true-class similarity via row-index == label select -> (1, tile_n) ---
    cls_ids = lax.broadcasted_iota(jnp.int32, sim.shape, 0)         # (C, tile_n)
    one_hot = (cls_ids == labels).astype(jnp.float32)
    true_sim = jnp.sum(sim * one_hot, axis=0, keepdims=True)

    # --- mask padded samples, lane-reduce, accumulate partial sum ---
    sample_ids = ((p * steps_per_chunk + i) * tile_n
                  + lax.broadcasted_iota(jnp.int32, (1, tile_n), 1))
    valid = (sample_ids < n_total).astype(jnp.float32)
    partial = jnp.sum((true_sim - lse) * valid, keepdims=True)      # (1, 1)
    out_ref[0:1, 0:1] += partial


def gprompt_tuning_loss(embedding, center_embedding, labels, tau=TAU, tile_n=None):
    """embedding: (N, D) float, center_embedding: (C, D) float, labels: (N,) int."""
    n, d = embedding.shape
    c = center_embedding.shape[0]
    center_embedding = center_embedding.astype(embedding.dtype)
    itemsize = embedding.dtype.itemsize

    budget = _vmem_budget_bytes()

    # --- tile size from a byte budget (includes the (C, tile_n) / (tile_n, D)
    # f32 intermediates, the double-buffered streamed tiles, and the resident,
    # single-buffered centers). Rounded to a multiple of 128 (covers bf16/int8
    # sublane packing and keeps the label blocks lane-aligned). ---
    c_pad = _round_up(c, 8)
    resident = c * d * itemsize + c_pad * 128 * 4
    per_row = 2 * d * itemsize + 3 * d * 4 + 6 * c_pad * 4 + 2 * 4
    if tile_n is None:
        avail = budget - resident - (2 << 20)
        tile_n = max(avail, per_row) // per_row
    tile_n = max(128, (int(tile_n) // 128) * 128)
    tile_n = min(tile_n, 32768, _round_up(n, 128))
    # TODO(synk): for very large C the resident (C, D) centers / (C, tile_n) sim can
    # exceed the VMEM budget; stream C tiles with an online logsumexp in that regime.

    n_steps = -(-n // tile_n)
    # Two parallel chunks over N -> both TensorCores on v7x; serial (harmless) on
    # v5e/v6e.  TODO(synk): query the actual TensorCore count instead of assuming 2.
    num_chunks = 2 if n_steps >= 2 else 1
    steps_per_chunk = -(-n_steps // num_chunks)
    n_pad = num_chunks * steps_per_chunk * tile_n

    labels = labels.astype(jnp.int32)
    if n_pad != n:
        embedding = jnp.pad(embedding, ((0, n_pad - n), (0, 0)))
        labels = jnp.pad(labels, (0, n_pad - n))
    labels2d = labels.reshape(1, n_pad)

    # Hoisted, one-time center norms (exact f32; product clamp happens in-kernel).
    ctr_f = center_embedding.astype(jnp.float32)
    cnorm = jnp.sqrt(jnp.sum(ctr_f * ctr_f, axis=-1, keepdims=True))   # (C, 1) f32

    kernel = functools.partial(_gprompt_loss_kernel, n_total=n,
                               steps_per_chunk=steps_per_chunk, tau=tau)

    out = pl.pallas_call(
        kernel,
        out_shape=jax.ShapeDtypeStruct((8, 128 * num_chunks), jnp.float32),
        grid_spec=pltpu.PrefetchScalarGridSpec(
            num_scalar_prefetch=0,
            grid=(num_chunks, steps_per_chunk),
            in_specs=[
                # streamed embedding tiles (double-buffered by default)
                pl.BlockSpec((tile_n, d), lambda p, i: (p * steps_per_chunk + i, 0)),
                # resident centers / center norms: constant index -> single buffer
                pl.BlockSpec((c, d), lambda p, i: (0, 0),
                             pipeline_mode=pl.Buffered(1)),
                pl.BlockSpec((c, 1), lambda p, i: (0, 0),
                             pipeline_mode=pl.Buffered(1)),
                # streamed lane-dense label tiles
                pl.BlockSpec((1, tile_n), lambda p, i: (0, p * steps_per_chunk + i)),
            ],
            # per-chunk accumulator block (lane-blocked so parallel chunks are disjoint)
            out_specs=pl.BlockSpec((8, 128), lambda p, i: (0, p)),
        ),
        compiler_params=pltpu.CompilerParams(
            dimension_semantics=("parallel", "arbitrary"),
            vmem_limit_bytes=int(budget),
        ),
    )(embedding, center_embedding, cnorm, labels2d)

    # -(sum of per-sample (true_sim - lse)) / N   (tiny XLA reduction over (8, 128*P))
    return -jnp.sum(out) / n


def _reference(embedding, center_embedding, labels, tau=TAU):
    # pure-JAX reference mirroring the PyTorch module
    e = embedding.astype(jnp.float32)
    c = center_embedding.astype(jnp.float32)
    en = jnp.linalg.norm(e, axis=-1, keepdims=True)
    cn = jnp.linalg.norm(c, axis=-1, keepdims=True)
    sim = (e @ c.T) / jnp.maximum(en * cn.T, EPS) / tau
    true_sim = sim[jnp.arange(e.shape[0]), labels]
    lse = jax.scipy.special.logsumexp(sim, axis=1)
    return -(true_sim - lse).mean()


if __name__ == "__main__":
    key = jax.random.PRNGKey(0)
    k1, k2, k3 = jax.random.split(key, 3)
    N, C, D = 300, 4, 32  # node embeddings, class centers, hidden dim (small demo)

    # bf16-representable f32 values so MXU (kernel) and XLA (reference) matmuls agree
    # to float32 accumulation-order noise regardless of default matmul precision.
    embedding = jax.random.normal(k1, (N, D), jnp.float32)
    embedding = embedding.astype(jnp.bfloat16).astype(jnp.float32)
    center_embedding = jax.random.normal(k2, (C, D), jnp.float32)
    center_embedding = center_embedding.astype(jnp.bfloat16).astype(jnp.float32)
    labels = jax.random.randint(k3, (N,), 0, C, dtype=jnp.int32)

    ref = _reference(embedding, center_embedding, labels)

    # forced small tile: 2 parallel chunks x 2 steps -> exercises init/accumulate
    # across the reduction axis plus the padded-row masking.
    loss_tiled = jax.block_until_ready(
        gprompt_tuning_loss(embedding, center_embedding, labels, tile_n=128))
    # auto tile size from the VMEM byte budget (single step here).
    loss_auto = jax.block_until_ready(
        gprompt_tuning_loss(embedding, center_embedding, labels))

    assert jnp.allclose(loss_tiled, ref, atol=1e-4, rtol=1e-4), (loss_tiled, ref)
    assert jnp.allclose(loss_auto, ref, atol=1e-4, rtol=1e-4), (loss_auto, ref)
    print("KERNEL_OK")
</pallas_src>

<mosaic_0001>
module attributes {stable_mosaic.version = 11 : i64} {
  func.func @_gprompt_loss_kernel(%arg0: i32, %arg1: i32, %arg2: memref<128x32xf32, #tpu.memory_space<vmem>>, %arg3: memref<4x32xf32, #tpu.memory_space<vmem>>, %arg4: memref<4x1xf32, #tpu.memory_space<vmem>>, %arg5: memref<1x128xi32, #tpu.memory_space<vmem>>, %arg6: memref<8x128xf32, #tpu.memory_space<vmem>>) attributes {dimension_semantics = [#tpu.dimension_semantics<parallel>, #tpu.dimension_semantics<arbitrary>], iteration_bounds = array<i64: 2, 2>, scalar_prefetch = 0 : i64, scratch_operands = 0 : i64, tpu.core_type = #tpu.core_type<tc>, window_params = [{transform_indices = @transform_0, window_bounds = array<i64: 128, 32>}, {pipeline_mode = #tpu.pipeline_mode<synchronous>, transform_indices = @transform_1, window_bounds = array<i64: 4, 32>}, {pipeline_mode = #tpu.pipeline_mode<synchronous>, transform_indices = @transform_2, window_bounds = array<i64: 4, 1>}, {transform_indices = @transform_3, window_bounds = array<i64: 1, 128>}, {transform_indices = @transform_4, window_bounds = array<i64: 8, 128>}]} {
    %c0_i32 = arith.constant 0 : i32
    %0 = arith.cmpi eq, %arg1, %c0_i32 : i32
    %1 = arith.extui %0 : i1 to i32
    %c0_i32_0 = arith.constant 0 : i32
    %2 = arith.cmpi ne, %1, %c0_i32_0 : i32
    scf.if %2 {
      %cst_21 = arith.constant 0.000000e+00 : f32
      %63 = vector.broadcast %cst_21 : f32 to vector<8x128xf32>
      %c0_22 = arith.constant 0 : index
      %c0_23 = arith.constant 0 : index
      %64 = vector.load %arg6[%c0_22, %c0_23] : memref<8x128xf32, #tpu.memory_space<vmem>>, vector<8x128xf32>
      tpu.vector_store %arg6[%c0_22, %c0_23], %63 {strides = array<i32>} : memref<8x128xf32, #tpu.memory_space<vmem>>, vector<8x128xf32>,
    } else {
    }
    %c0 = arith.constant 0 : index
    %c0_1 = arith.constant 0 : index
    %3 = vector.load %arg2[%c0, %c0_1] : memref<128x32xf32, #tpu.memory_space<vmem>>, vector<128x32xf32>
    %c0_2 = arith.constant 0 : index
    %c0_3 = arith.constant 0 : index
    %4 = vector.load %arg3[%c0_2, %c0_3] : memref<4x32xf32, #tpu.memory_space<vmem>>, vector<4x32xf32>
    %c0_4 = arith.constant 0 : index
    %c0_5 = arith.constant 0 : index
    %5 = vector.load %arg4[%c0_4, %c0_5] : memref<4x1xf32, #tpu.memory_space<vmem>>, vector<4x1xf32>
    %c0_6 = arith.constant 0 : index
    %c0_7 = arith.constant 0 : index
    %6 = vector.load %arg5[%c0_6, %c0_7] : memref<1x128xi32, #tpu.memory_space<vmem>>, vector<1x128xi32>
    %cst = arith.constant dense<0.000000e+00> : vector<4x128xf32>
    %7 = tpu.matmul %4, %3, %cst {dimension_numbers = #tpu.dot_dimension_numbers<[1], [1], [0], [0], [0, 0, 1, 0], [], []>} : vector<4x32xf32>, vector<128x32xf32>, vector<4x128xf32> -> vector<4x128xf32>
    %8 = arith.mulf %3, %3 : vector<128x32xf32>
    %9 = arith.truncf %8 : vector<128x32xf32> to vector<128x32xbf16>
    %10 = arith.extf %9 : vector<128x32xbf16> to vector<128x32xf32>
    %11 = arith.subf %8, %10 : vector<128x32xf32>
    %cst_8 = arith.constant 1.000000e+00 : f32
    %12 = vector.broadcast %cst_8 : f32 to vector<8x32xf32>
    %cst_9 = arith.constant dense<0.000000e+00> : vector<8x128xf32>
    %13 = tpu.matmul %12, %10, %cst_9 {dimension_numbers = #tpu.dot_dimension_numbers<[1], [1], [0], [0], [0, 0, 1, 0], [], []>} : vector<8x32xf32>, vector<128x32xf32>, vector<8x128xf32> -> vector<8x128xf32>
    %cst_10 = arith.constant dense<0.000000e+00> : vector<8x128xf32>
    %14 = tpu.matmul %12, %11, %cst_10 {dimension_numbers = #tpu.dot_dimension_numbers<[1], [1], [0], [0], [0, 0, 1, 0], [], []>} : vector<8x32xf32>, vector<128x32xf32>, vector<8x128xf32> -> vector<8x128xf32>
    %15 = arith.addf %13, %14 : vector<8x128xf32>
    %16 = vector.extract_strided_slice %15 {offsets = [0, 0], sizes = [1, 128], strides = [1, 1]} : vector<8x128xf32> to vector<1x128xf32>
    %17 = math.sqrt %16 : vector<1x128xf32>
    %18 = vector.broadcast %17 : vector<1x128xf32> to vector<4x128xf32>
    %19 = vector.broadcast %5 : vector<4x1xf32> to vector<4x128xf32>
    %20 = arith.mulf %18, %19 : vector<4x128xf32>
    %cst_11 = arith.constant 9.99999993E-9 : f32
    %21 = vector.broadcast %cst_11 : f32 to vector<4x128xf32>
    %22 = arith.maximumf %20, %21 : vector<4x128xf32>
    %23 = arith.divf %7, %22 : vector<4x128xf32>
    %cst_12 = arith.constant 1.000000e+01 : f32
    %24 = vector.broadcast %cst_12 : f32 to vector<4x128xf32>
    %25 = arith.mulf %23, %24 : vector<4x128xf32>
    %cst_13 = arith.constant dense<0xFF800000> : vector<128xf32>
    %26 = vector.multi_reduction <maximumf>, %25, %cst_13 [0] : vector<4x128xf32> to vector<128xf32>
    %27 = vector.shape_cast %26 : vector<128xf32> to vector<1x128xf32>
    %28 = vector.broadcast %27 : vector<1x128xf32> to vector<4x128xf32>
    %29 = arith.subf %25, %28 : vector<4x128xf32>
    %30 = math.exp %29 : vector<4x128xf32>
    %cst_14 = arith.constant dense<0.000000e+00> : vector<128xf32>
    %31 = vector.multi_reduction <add>, %30, %cst_14 [0] : vector<4x128xf32> to vector<128xf32>
    %32 = vector.shape_cast %31 : vector<128xf32> to vector<1x128xf32>
    %33 = math.log %32 : vector<1x128xf32>
    %34 = arith.addf %27, %33 : vector<1x128xf32>
    %35 = tpu.iota {dimensions = array<i32: 0>} : vector<4x128xi32>
    %36 = vector.broadcast %6 : vector<1x128xi32> to vector<4x128xi32>
    %37 = arith.cmpi eq, %35, %36 : vector<4x128xi32>
    %38 = arith.extui %37 : vector<4x128xi1> to vector<4x128xi32>
    %39 = arith.sitofp %38 : vector<4x128xi32> to vector<4x128xf32>
    %40 = arith.mulf %25, %39 : vector<4x128xf32>
    %cst_15 = arith.constant dense<0.000000e+00> : vector<128xf32>
    %41 = vector.multi_reduction <add>, %40, %cst_15 [0] : vector<4x128xf32> to vector<128xf32>
    %42 = vector.shape_cast %41 : vector<128xf32> to vector<1x128xf32>
    %c2_i32 = arith.constant 2 : i32
    %43 = arith.muli %arg0, %c2_i32 : i32
    %44 = arith.addi %43, %arg1 : i32
    %c128_i32 = arith.constant 128 : i32
    %45 = arith.muli %44, %c128_i32 : i32
    %46 = tpu.iota {dimensions = array<i32: 1>} : vector<1x128xi32>
    %47 = vector.broadcast %45 : i32 to vector<1x128xi32>
    %48 = arith.addi %47, %46 : vector<1x128xi32>
    %c300_i32 = arith.constant 300 : i32
    %49 = vector.broadcast %c300_i32 : i32 to vector<1x128xi32>
    %50 = arith.cmpi slt, %48, %49 : vector<1x128xi32>
    %51 = arith.extui %50 : vector<1x128xi1> to vector<1x128xi32>
    %52 = arith.sitofp %51 : vector<1x128xi32> to vector<1x128xf32>
    %53 = arith.subf %42, %34 : vector<1x128xf32>
    %54 = arith.mulf %53, %52 : vector<1x128xf32>
    %55 = vector.shape_cast %54 : vector<1x128xf32> to vector<1x1x128xf32>
    %cst_16 = arith.constant dense<0.000000e+00> : vector<1xf32>
    %56 = vector.multi_reduction <add>, %55, %cst_16 [1, 2] : vector<1x1x128xf32> to vector<1xf32>
    %57 = vector.shape_cast %56 : vector<1xf32> to vector<1x1x1xf32>
    %58 = vector.extract %57[0, 0, 0] : f32 from vector<1x1x1xf32>
    %59 = vector.broadcast %58 : f32 to vector<1x1xf32>
    %c0_17 = arith.constant 0 : index
    %c0_18 = arith.constant 0 : index
    %60 = vector.load %arg6[%c0_17, %c0_18] : memref<8x128xf32, #tpu.memory_space<vmem>>, vector<1x1xf32>
    %61 = arith.addf %60, %59 : vector<1x1xf32>
    %c0_19 = arith.constant 0 : index
    %c0_20 = arith.constant 0 : index
    %62 = vector.load %arg6[%c0_19, %c0_20] : memref<8x128xf32, #tpu.memory_space<vmem>>, vector<1x1xf32>
    tpu.vector_store %arg6[%c0_19, %c0_20], %61 {strides = array<i32>} : memref<8x128xf32, #tpu.memory_space<vmem>>, vector<1x1xf32>,
    return
  }
  func.func @transform_0(%arg0: i32, %arg1: i32) -> (i32, i32) {
    %c2_i32 = arith.constant 2 : i32
    %0 = arith.muli %arg0, %c2_i32 : i32
    %1 = arith.addi %0, %arg1 : i32
    %c0_i32 = arith.constant 0 : i32
    %c0_i32_0 = arith.constant 0 : i32
    return %1, %c0_i32 : i32, i32
  }
  func.func @transform_1(%arg0: i32, %arg1: i32) -> (i32, i32) {
    %c0_i32 = arith.constant 0 : i32
    %c0_i32_0 = arith.constant 0 : i32
    %c0_i32_1 = arith.constant 0 : i32
    return %c0_i32, %c0_i32_0 : i32, i32
  }
  func.func @transform_2(%arg0: i32, %arg1: i32) -> (i32, i32) {
    %c0_i32 = arith.constant 0 : i32
    %c0_i32_0 = arith.constant 0 : i32
    %c0_i32_1 = arith.constant 0 : i32
    return %c0_i32, %c0_i32_0 : i32, i32
  }
  func.func @transform_3(%arg0: i32, %arg1: i32) -> (i32, i32) {
    %c2_i32 = arith.constant 2 : i32
    %0 = arith.muli %arg0, %c2_i32 : i32
    %1 = arith.addi %0, %arg1 : i32
    %c0_i32 = arith.constant 0 : i32
    %c0_i32_0 = arith.constant 0 : i32
    return %c0_i32, %1 : i32, i32
  }
  func.func @transform_4(%arg0: i32, %arg1: i32) -> (i32, i32) {
    %c0_i32 = arith.constant 0 : i32
    %c0_i32_0 = arith.constant 0 : i32
    return %c0_i32, %arg0 : i32, i32
  }
}

</mosaic_0001>

<bundles_post_ra>
// kernel: tpu_custom_call.1
= control target key start
LH: loop header
LB: loop body
LE: loop exit
PB: predicated region body
PF: predicated region fallthrough
CT: control target
= control target key end

     0   :  { %9 = vsyncpa [#allocation3], 0  ;;  %s1254_s0 = inlined_call_operand.vmem [shape: f32[512,32], index: 0, kind: input, shape index: {}]   ;;  %s1255_s1 = inlined_call_operand.vmem [shape: f32[4,32], index: 1, kind: input, shape index: {}]   ;;  %s1256_s2 = inlined_call_operand.vmem [shape: f32[4,1], index: 2, kind: input, shape index: {}]   ;;  %s1257_s3 = inlined_call_operand.vmem [shape: s32[1,512], index: 3, kind: input, shape index: {}]   ;;  %s1258_s4 = inlined_call_operand.hbm [shape: f32[8,256], index: 4, kind: output, shape index: {}]  }
   0x1   :  { %11 = vsyncpa [#allocation3 + $0x1], 0  ;;  %s1031_s15 = smov 0   ;;  %s1033_s16 = smov 0  }
   0x2   :  { %s1035_s17 = smov 0   ;;  %s1037_s18 = smov 0  }
   0x3   :  { %s1039_s19 = smov 0   ;;  %s1041_s20 = smov 0  }
   0x4   :  { %s1043_s21 = smov 0   ;;  %s1045_s22 = smov 0  }
   0x5 LB: > { %s745_s23 = sadd.s32 4294967295, %s1000_s22   ;;  %s746_s24 = sadd.s32 4294967294, %s1000_s22   ;;  %s1000_s22 = sphi %s1045_s22, %s17_s22   ;;  %s996_s21 = sphi %s1043_s21, %s1267_s21   ;;  %s992_s20 = sphi %s1041_s20, %s1266_s20   ;;  %s988_s19 = sphi %s1039_s19, %s1265_s19   ;;  %s984_s18 = sphi %s1037_s18, %s1264_s18   ;;  %s980_s17 = sphi %s1035_s17, %s1263_s17   ;;  %s976_s16 = sphi %s1033_s16, %s1262_s16   ;;  %s972_s15 = sphi %s1031_s15, %s1261_s15  }
   0x6   : > { %s26_s25 = sadd.s32 1, %s992_s20  ;;  %s29_s26 = sadd.s32 1, %s996_s21 }
   0x7   : > { %p27_p0 = scmp.ge.s32.totalorder %s26_s25, 2  ;;  %p148_p1 = scmp.ne.s32.totalorder %s980_s17, %s976_s16 }
   0x8   : > { %p149_p2 = scmp.eq.s32.totalorder %s745_s23, 3  ;;  %p154_p4 = scmp.ne.s32.totalorder %s976_s16, %s972_s15 }
   0x9   : > { %s1269_s25 = smov (%p27_p0, %s26_s25), 0  ;;  %s1271_s26 = smov (!%p27_p0, %s29_s26), %s996_s21 }
   0xa   : > { %p1080_p3 = por %p149_p2, %p148_p1  ;;  %p31_p5 = scmp.ge.s32.totalorder %s1271_s26, 2 }
   0xb   : > { %p155_p6 = scmp.eq.s32.totalorder %s746_s24, 3  ;;  %p753_p7 = scmp.ge.s32.totalorder %s1000_s22, 1 }
   0xc   : > { %p202_p8 = scmp.lt.s32.totalorder %s1000_s22, 5  ;;  %s1273_s26 = smov (%p31_p5, %s1271_s26), 0 }
   0xd   : > { %p1090_p9 = por %p155_p6, %p154_p4  ;;  %s135_s29 = ssub.s32 %s996_s21, %s1273_s26 }
   0xe   : > { %p203_p10 = pnand %p753_p7, %p202_p8  ;;  %s138_s30 = sadd.s32 1, %s980_s17 }
   0xf   : > { %p136_p11 = scmp.eq.s32.totalorder %s135_s29, 0  ;;  %s232_s6 = sand.u32 (!%p203_p10), 1, %s976_s16  }
  0x10   : > { %206 = sbr.rel (%p203_p10) target bundleno = 520 (0x208), region = 36  ;;  %s755_s7 = sshll.u32 (!%p203_p10), %s988_s19, 1 }
  0x11   : > { %s1098_s5 = scalar_select %p136_p11, %s980_s17, %s138_s30  }
  0x12   : > { %s754_s8 = sshll.u32 (!%p203_p10), %s232_s6, 3  ;;  %s1105_s9 = sadd.s32 (!%p203_p10), %s984_s18, %s755_s7 }
  0x13   : > { %s756_s10 = sshll.u32 (!%p203_p10), %s1105_s9, 4  ;;  %p247_p13 = scmp.lt.s32.totalorder (!%p203_p10), %s1105_s9, 3 }
  0x14   : > { %p238_p12 = scmp.lt.s32.totalorder (!%p203_p10), %s756_s10, 63  ;;  %s1121_s7 = scalar_lea.vmem (!%p203_p10), [#allocation2], %s754_s8 }
  0x15   : > { %s1110_s11 = scalar_select %p247_p13, %s1105_s9, 3 }
  0x16   : > { %s1275_s10 = smov (!%p238_p12, %s756_s10), 63  ;;  %p759_p0 = scmp.ne.s32.totalorder %s984_s18, 0 }
  0x17   : > { %s757_s12 = sshll.u32 %s1275_s10, 3  ;;  %s249_s30 = scalar_lea.vmem %s1257_s3, %s1110_s11 }
  0x18   : > { %s1115_s23 = scalar_lea.vmem %s1254_s0, %s757_s12  ;;  %255 = sbr.rel (%p759_p0) target bundleno = 31 (0x1f), region = 40 }
  0x1d   : > { %v1002_v0 = vmov 0.0  }
  0x1e   : > { %256 = vst [vmem:[%s1121_s7] sm:$0xff] %v1002_v0 }
  0x1f PF: > { %v272_v1 = vld [vmem:[%s1115_s23 + $0x78] sm:$0xff]  ;;  %vm276_vm0 = vcmask 261120   ;;  %v271_v2 = vld [vmem:[%s1115_s23 + $0x70] sm:$0xff]  ;;  %v270_v3 = vld [vmem:[%s1115_s23 + $0x68] sm:$0xff]  ;;  %v1003_v58 = vmov 0   ;;  %vm587_vm7 = vcmask 1043456  }
  0x20   : > { %v363_v4 = vmul.f32 %v272_v1, %v272_v1  ;;  %v362_v5 = vmul.f32 %v271_v2, %v271_v2  ;;  %760 = vmatpush.xpose.msk.msra.mxu0 %vm276_vm0, %v272_v1  ;;  %v361_v8 = vmul.f32 %v270_v3, %v270_v3  ;;  %v269_v9 = vld [vmem:[%s1115_s23 + $0x60] sm:$0xff]  ;;  %v268_v15 = vld [vmem:[%s1115_s23 + $0x58] sm:$0xff]  ;;  %v267_v20 = vld [vmem:[%s1115_s23 + $0x50] sm:$0xff]  ;;  %896 = vset.pattern.permute.xlu0 %v1003_v58  ;;  %s813_s11 = sshll.u32 %s1105_s9, 7  ;;  %vm634_vm10 = vcmask 1040384   ;;  %s816_s9 = sshll.u32 %s988_s19, 3 }
  0x21   : > { %v360_v14 = vmul.f32 %v269_v9, %v269_v9  ;;  %v359_v19 = vmul.f32 %v268_v15, %v268_v15  ;;  %v358_v24 = vmul.f32 %v267_v20, %v267_v20  ;;  %v266_v25 = vld [vmem:[%s1115_s23 + $0x48] sm:$0xff]  ;;  %v265_v30 = vld [vmem:[%s1115_s23 + $0x40] sm:$0xff]  ;;  %v264_v35 = vld [vmem:[%s1115_s23 + $0x38] sm:$0xff]  ;;  %s661_s29 = scalar_lea.hbm %s1258_s4, %s816_s9  ;;  %vm648_vm11 = vcmask 0   ;;  %s651_s10 = scalar_lea.sflag [#allocation3], %s232_s6 }
  0x22   : > { %v379_v6 = vpack.c.bf16 %v363_v4, %v363_v4  ;;  %v378_v7 = vpack.c.bf16 %v362_v5, %v362_v5  ;;  %v377_v13 = vpack.c.bf16 %v361_v8, %v361_v8  ;;  %v357_v29 = vmul.f32 %v266_v25, %v266_v25  ;;  %v263_v40 = vld [vmem:[%s1115_s23 + $0x30] sm:$0xff]  ;;  %v262_v45 = vld [vmem:[%s1115_s23 + $0x28] sm:$0xff]  ;;  %v261_v50 = vld [vmem:[%s1115_s23 + $0x20] sm:$0xff]  ;;  %s665_s18 = sshll.u32 %s661_s29, 4  ;;  %s666_s18 = int_to_ptr.hbm [resolvable:$true] %s665_s18 }
  0x23   : > { %v376_v18 = vpack.c.bf16 %v360_v14, %v360_v14  ;;  %v375_v23 = vpack.c.bf16 %v359_v19, %v359_v19  ;;  %v374_v28 = vpack.c.bf16 %v358_v24, %v358_v24  ;;  %v356_v34 = vmul.f32 %v265_v30, %v265_v30  ;;  %v260_v55 = vld [vmem:[%s1115_s23 + $0x18] sm:$0xff]  ;;  %v274_v56 = vld [vmem:[%s1256_s2] sm:$0xf]  ;;  %v259_v62 = vld [vmem:[%s1115_s23 + $0x10] sm:$0xff]  ;;  %s920_s12 = sshra.s32 %s666_s18, 4  ;;  %s921_s12 = int_to_ptr.hbm [resolvable:$true] %s920_s12 }
  0x24   : > { %v395_v10 = vunpack.c.l.bf16 %v379_v6  ;;  %761 = vmatpush.xpose.msk.msra.mxu0 %vm276_vm0, %v271_v2  ;;  %v394_v11 = vunpack.c.l.bf16 %v378_v7  ;;  %v393_v17 = vunpack.c.l.bf16 %v377_v13  ;;  %v373_v33 = vpack.c.bf16 %v357_v29, %v357_v29  ;;  %566 = vperm.xlu0 %896, %v274_v56   ;;  %s922_s19 = scalar_lea.hbm %s921_s12, 8  ;;  %p927_p5 = scmp.lt.s32.totalorder %s921_s12, %s1258_s4 }
  0x25   : > { %v392_v22 = vunpack.c.l.bf16 %v376_v18  ;;  %v391_v27 = vunpack.c.l.bf16 %v375_v23  ;;  %v390_v32 = vunpack.c.l.bf16 %v374_v28  ;;  %v372_v38 = vpack.c.bf16 %v356_v34, %v356_v34  ;;  %p923_p1 = scmp.ne.s32.totalorder %s921_s12, %s922_s19 }
  0x26   : > { %794 = vmatpush.xpose.msk.msra.mxu2 %vm276_vm0, %v395_v10  ;;  %v411_v12 = vsub.f32 %v363_v4, %v395_v10  ;;  %v410_v16 = vsub.f32 %v362_v5, %v394_v11  ;;  %v409_v21 = vsub.f32 %v361_v8, %v393_v17  ;;  %v389_v37 = vunpack.c.l.bf16 %v373_v33  ;;  %v257_v8 = vld [vmem:[%s1115_s23] sm:$0xff] }
  0x27   : > { %v408_v26 = vsub.f32 %v360_v14, %v392_v22  ;;  %v407_v31 = vsub.f32 %v359_v19, %v391_v27  ;;  %v406_v36 = vsub.f32 %v358_v24, %v390_v32  ;;  %v355_v39 = vmul.f32 %v264_v35, %v264_v35  ;;  %p924_p2 = pnand %p923_p1, %p1080_p3 }
  0x28   : > { %777 = vmatpush.xpose.msk.msra.mxu1 %vm276_vm0, %v411_v12  ;;  %762 = vmatpush.xpose.msk.msra.mxu0 %vm276_vm0, %v270_v3  ;;  %v405_v41 = vsub.f32 %v357_v29, %v389_v37  ;;  %v388_v42 = vunpack.c.l.bf16 %v372_v38  ;;  %v354_v44 = vmul.f32 %v263_v40, %v263_v40  ;;  %v353_v49 = vmul.f32 %v262_v45, %v262_v45  ;;  %v258_v3 = vld [vmem:[%s1115_s23 + $0x8] sm:$0xff] }
  0x29   : > { %v371_v43 = vpack.c.bf16 %v355_v39, %v355_v39  ;;  %v352_v54 = vmul.f32 %v261_v50, %v261_v50  ;;  %v351_v61 = vmul.f32 %v260_v55, %v260_v55  ;;  %v350_v2 = vmul.f32 %v259_v62, %v259_v62  ;;  %p925_p4 = pneg %p924_p2 }
  0x2a   : > { %795 = vmatpush.xpose.msk.msra.mxu2 %vm276_vm0, %v394_v11  ;;  %v404_v46 = vsub.f32 %v356_v34, %v388_v42  ;;  %v370_v48 = vpack.c.bf16 %v354_v44, %v354_v44  ;;  %v369_v53 = vpack.c.bf16 %v353_v49, %v353_v49  ;;  %v349_v7 = vmul.f32 %v258_v3, %v258_v3 }
  0x2b   : > { %v387_v47 = vunpack.c.l.bf16 %v371_v43  ;;  %v368_v60 = vpack.c.bf16 %v352_v54, %v352_v54  ;;  %v367_v1 = vpack.c.bf16 %v351_v61, %v351_v61  ;;  %v366_v6 = vpack.c.bf16 %v350_v2, %v350_v2 }
  0x2c   : > { %778 = vmatpush.xpose.msk.msra.mxu1 %vm276_vm0, %v410_v16  ;;  %763 = vmatpush.xpose.msk.msra.mxu0 %vm276_vm0, %v269_v9  ;;  %v386_v52 = vunpack.c.l.bf16 %v370_v48  ;;  %v385_v59 = vunpack.c.l.bf16 %v369_v53  ;;  %v365_v11 = vpack.c.bf16 %v349_v7, %v349_v7  ;;  %v348_v12 = vmul.f32 %v257_v8, %v257_v8 }
  0x2d   : > { %v403_v51 = vsub.f32 %v355_v39, %v387_v47  ;;  %v384_v0 = vunpack.c.l.bf16 %v368_v60  ;;  %v383_v5 = vunpack.c.l.bf16 %v367_v1  ;;  %v382_v10 = vunpack.c.l.bf16 %v366_v6 }
  0x2e   : > { %796 = vmatpush.xpose.msk.msra.mxu2 %vm276_vm0, %v393_v17  ;;  %v402_v57 = vsub.f32 %v354_v44, %v386_v52  ;;  %v401_v63 = vsub.f32 %v353_v49, %v385_v59  ;;  %v381_v14 = vunpack.c.l.bf16 %v365_v11  ;;  %v273_v17 = vld [vmem:[%s1255_s1] sm:$0xf] }
  0x2f   : > { %v400_v4 = vsub.f32 %v352_v54, %v384_v0  ;;  %v399_v9 = vsub.f32 %v351_v61, %v383_v5  ;;  %v398_v13 = vsub.f32 %v350_v2, %v382_v10 }
  0x30   : > { %779 = vmatpush.xpose.msk.msra.mxu1 %vm276_vm0, %v409_v21  ;;  %764 = vmatpush.xpose.msk.msra.mxu0 %vm276_vm0, %v268_v15  ;;  %v364_v15 = vpack.c.bf16 %v348_v12, %v348_v12  ;;  %v397_v16 = vsub.f32 %v349_v7, %v381_v14 }
  0x32   : > { %797 = vmatpush.xpose.msk.msra.mxu2 %vm276_vm0, %v392_v22  ;;  %v380_v18 = vunpack.c.l.bf16 %v364_v15  ;;  %v627_v15 = vstv %s813_s11  ;;  %s926_s11 = scalar_lea.hbm %s1258_s4, 16 }
  0x33   : > { %p928_p6 = scmp.lt.s32.totalorder %s926_s11, %s922_s19 }
  0x34   : > { %780 = vmatpush.xpose.msk.msra.mxu1 %vm276_vm0, %v408_v26  ;;  %765 = vmatpush.xpose.msk.msra.mxu0 %vm276_vm0, %v267_v20  ;;  %v396_v19 = vsub.f32 %v348_v12, %v380_v18  ;;  %v1004_v20 = vmov 1.0  }
  0x35   : > { %p929_p7 = por %p928_p6, %p927_p5 }
  0x36   : > { %798 = vmatpush.xpose.msk.msra.mxu2 %vm276_vm0, %v391_v27 }
  0x37   : > { %p930_p8 = pnand %p929_p7, %p925_p4 }
  0x38   : > { %781 = vmatpush.xpose.msk.msra.mxu1 %vm276_vm0, %v407_v31  ;;  %766 = vmatpush.xpose.msk.msra.mxu0 %vm276_vm0, %v266_v25 }
  0x3a   : > { %799 = vmatpush.xpose.msk.msra.mxu2 %vm276_vm0, %v390_v32 }
  0x3c   : > { %782 = vmatpush.xpose.msk.msra.mxu1 %vm276_vm0, %v406_v36  ;;  %767 = vmatpush.xpose.msk.msra.mxu0 %vm276_vm0, %v265_v30 }
  0x3e   : > { %800 = vmatpush.xpose.msk.msra.mxu2 %vm276_vm0, %v389_v37 }
  0x40   : > { %783 = vmatpush.xpose.msk.msra.mxu1 %vm276_vm0, %v405_v41  ;;  %768 = vmatpush.xpose.msk.msra.mxu0 %vm276_vm0, %v264_v35 }
  0x42   : > { %801 = vmatpush.xpose.msk.msra.mxu2 %vm276_vm0, %v388_v42 }
  0x44   : > { %784 = vmatpush.xpose.msk.msra.mxu1 %vm276_vm0, %v404_v46  ;;  %769 = vmatpush.xpose.msk.msra.mxu0 %vm276_vm0, %v263_v40 }
  0x46   : > { %802 = vmatpush.xpose.msk.msra.mxu2 %vm276_vm0, %v387_v47 }
  0x48   : > { %785 = vmatpush.xpose.msk.msra.mxu1 %vm276_vm0, %v403_v51  ;;  %770 = vmatpush.xpose.msk.msra.mxu0 %vm276_vm0, %v262_v45 }
  0x4a   : > { %803 = vmatpush.xpose.msk.msra.mxu2 %vm276_vm0, %v386_v52 }
  0x4c   : > { %786 = vmatpush.xpose.msk.msra.mxu1 %vm276_vm0, %v402_v57  ;;  %771 = vmatpush.xpose.msk.msra.mxu0 %vm276_vm0, %v261_v50 }
  0x4e   : > { %804 = vmatpush.xpose.msk.msra.mxu2 %vm276_vm0, %v385_v59  ;;  %v897_v59 = vld [vmem:[%s249_s30] ss:$0 sm:$0xff]  ;;  %s663_s30 = sshll.u32 %s1121_s7, 4  ;;  %s664_s30 = int_to_ptr.vmem [resolvable:$true] %s663_s30 }
  0x50   : > { %787 = vmatpush.xpose.msk.msra.mxu1 %vm276_vm0, %v401_v63  ;;  %772 = vmatpush.xpose.msk.msra.mxu0 %vm276_vm0, %v260_v55  ;;  %v608_v55 = vlaneseq  ;;  %v1005_v63 = vmov 0.0  }
  0x52   : > { %805 = vmatpush.xpose.msk.msra.mxu2 %vm276_vm0, %v384_v0  ;;  %v609_v58 = vshrl.u32 %v608_v55, 7 }
  0x54   : > { %788 = vmatpush.xpose.msk.msra.mxu1 %vm276_vm0, %v400_v4  ;;  %773 = vmatpush.xpose.msk.msra.mxu0 %vm276_vm0, %v259_v62  ;;  %vm611_vm8 = vcmp.eq.s32.totalorder %v609_v58, %v897_v59 }
  0x55   : > { %v811_v0 = vsel %vm611_vm8, 1.0, %v1005_v63 }
  0x56   : > { %806 = vmatpush.xpose.msk.msra.mxu2 %vm276_vm0, %v383_v5 }
  0x58   : > { %789 = vmatpush.xpose.msk.msra.mxu1 %vm276_vm0, %v399_v9  ;;  %774 = vmatpush.xpose.msk.msra.mxu0 %vm276_vm0, %v258_v3 }
  0x5a   : > { %807 = vmatpush.xpose.msk.msra.mxu2 %vm276_vm0, %v382_v10 }
  0x5c   : > { %790 = vmatpush.xpose.msk.msra.mxu1 %vm276_vm0, %v398_v13  ;;  %775 = vmatpush.xpose.msk.msra.mxu0 %vm276_vm0, %v257_v8 }
  0x5e   : > { %808 = vmatpush.xpose.msk.msra.mxu2 %vm276_vm0, %v381_v14  ;;  %v626_v14 = vand.u32 127, %v608_v55 }
  0x5f   : > { %776 = vmatmul.msk.f32.vlgmr.msra.gmra.mxu0 %vm276_vm0, %v273_v17 }
  0x60   : > { %791 = vmatpush.xpose.msk.msra.mxu1 %vm276_vm0, %v397_v16  ;;  %v628_v17 = vadd.s32 %v627_v15, %v626_v14 }
  0x62   : > { %809 = vmatpush.xpose.msk.msra.mxu2 %vm276_vm0, %v380_v18  ;;  %vm629_vm9 = vcmp.lt.s32.totalorder %v628_v17, 300 }
  0x64   : > { %792 = vmatpush.xpose.msk.msra.mxu1 %vm276_vm0, %v396_v19 }
  0x65   : > { %810 = vmatmul.msk.f32.vlgmr.msra.gmra.mxu2 %vm276_vm0, %v1004_v20 }
  0x67   : > { %793 = vmatmul.msk.f32.vlgmr.msra.gmra.mxu1 %vm276_vm0, %v1004_v20 }
  0x96   : > { %v567_v33 = vpop.permute.xlu0 %566 }
  0xdc   : > { %v345_v45 = vpop.f32.mrf.mxu0 }
  0xe4   : > { %v480_v21 = vpop.f32.mrf.mxu1 }
  0xe8   : > { %v548_v22 = vpop.f32.mrf.mxu2 }
  0xe9   : > { %v549_v23 = vadd.f32 %v548_v22, %v480_v21 }
  0xeb   : > { %898 = vrsqrt.f32 %v549_v23  ;;  %vm558_vm1 = vcmp.eq.f32.partialorder %v549_v23, inf  ;;  %v561_v31 = vand.u32 2147483648, %v549_v23  ;;  %vm560_vm2 = vcmp.eq.f32.partialorder %v549_v23, 0.0 }
  0xf1   : > { %v899_v24 = vpop.eup %898 }
  0xf2   : > { %v552_v25 = vmul.f32 %v899_v24, %v549_v23 }
  0xf4   : > { %v553_v26 = vmul.f32 %v899_v24, %v552_v25 }
  0xf6   : > { %v554_v27 = vmul.f32 0.5, %v553_v26 }
  0xf8   : > { %v555_v28 = vsub.f32 1.5, %v554_v27 }
  0xfa   : > { %v556_v29 = vmul.f32 %v899_v24, %v555_v28 }
  0xfc   : > { %v557_v30 = vmul.f32 %v556_v29, %v549_v23 }
  0xfe   : > { %v559_v32 = vsel %vm558_vm1, %v549_v23, %v557_v30  ;;  %v814_v23 = vsel %vm629_vm9, 1.0, %v1005_v63 }
  0xff   : > { %v562_v34 = vsel %vm560_vm2, %v561_v31, %v559_v32 }
 0x100   : > { %v563_v35 = vperm.slane %v562_v34, 0  ;;  %v646_v34 = vld [vmem:[%s1121_s7] sm:$0x1] }
 0x102   : > { %v569_v36 = vmul.f32 %v567_v33, %v563_v35 }
 0x104   : > { %v570_v37 = vmax.f32 %v569_v36, 1e-08 }
 0x106   : > { %900 = vrcp.f32 %v570_v37  ;;  %v582_v41 = vand.u32 2147483648, %v570_v37  ;;  %v580_v43 = vand.u32 2147483647, %v570_v37  ;;  %vm576_vm4 = vweird.f32 %v570_v37 }
 0x108   : > { %v583_v46 = vor.u32 1.1754944e-38, %v582_v41  ;;  %vm581_vm6 = vcmp.eq.f32.partialorder %v580_v43, 8.507059e+37 }
 0x10c   : > { %v901_v38 = vpop.eup %900 }
 0x10d   : > { %v572_v39 = vmul.f32 %v901_v38, %v570_v37  ;;  %vm577_vm3 = vweird.f32 %v901_v38 }
 0x10e   : > { %vm578_vm5 = vmor %vm576_vm4, %vm577_vm3 }
 0x10f   : > { %v573_v40 = vsub.f32 1.0, %v572_v39 }
 0x111   : > { %v574_v42 = vmul.f32 %v901_v38, %v573_v40 }
 0x113   : > { %v575_v44 = vadd.f32 %v901_v38, %v574_v42 }
 0x115   : > { %v579_v47 = vsel %vm578_vm5, %v901_v38, %v575_v44 }
 0x116   : > { %v584_v48 = vsel %vm581_vm6, %v583_v46, %v579_v47 }
 0x117   : > { %v585_v49 = vmul.f32 %v584_v48, %v345_v45 }
 0x119   : > { %v586_v50 = vmul.f32 10.0, %v585_v49 }
 0x11b   : > { %v588_v51 = vsel %vm587_vm7, %v586_v50, -inf  ;;  %v614_v1 = vmul.f32 %v811_v0, %v586_v50 }
 0x11c   : > { %v589_v52 = vrot.slane %v588_v51, 4 }
 0x11d   : > { %v615_v3 = vsel %vm587_vm7, %v614_v1, 0.0 }
 0x11e   : > { %v590_v53 = vmax.f32 %v588_v51, %v589_v52  ;;  %v616_v6 = vrot.slane %v615_v3, 4 }
 0x120   : > { %v591_v54 = vrot.slane %v590_v53, 2  ;;  %v617_v9 = vadd.f32 %v616_v6, %v615_v3 }
 0x122   : > { %v592_v56 = vmax.f32 %v590_v53, %v591_v54  ;;  %v618_v12 = vrot.slane %v617_v9, 2 }
 0x124   : > { %v593_v57 = vrot.slane %v592_v56, 1  ;;  %v619_v16 = vadd.f32 %v618_v12, %v617_v9 }
 0x126   : > { %v594_v60 = vmax.f32 %v592_v56, %v593_v57  ;;  %v620_v18 = vrot.slane %v619_v16, 1 }
 0x128   : > { %v595_v61 = vsub.f32 %v586_v50, %v594_v60  ;;  %v621_v22 = vadd.f32 %v620_v18, %v619_v16 }
 0x12a   : > { %v596_v62 = vmul.f32 1.442695, %v595_v61 }
 0x12c   : > { %902 = vpow2.f32 %v596_v62 }
 0x132   : > { %v903_v2 = vpop.eup %902 }
 0x133   : > { %v598_v4 = vsel %vm587_vm7, %v903_v2, 0.0 }
 0x134   : > { %v599_v5 = vrot.slane %v598_v4, 4 }
 0x136   : > { %v600_v7 = vadd.f32 %v599_v5, %v598_v4 }
 0x138   : > { %v601_v8 = vrot.slane %v600_v7, 2 }
 0x13a   : > { %v602_v10 = vadd.f32 %v601_v8, %v600_v7 }
 0x13c   : > { %v603_v11 = vrot.slane %v602_v10, 1 }
 0x13e   : > { %v604_v13 = vadd.f32 %v603_v11, %v602_v10 }
 0x140   : > { %904 = vlog2.f32 %v604_v13 }
 0x146   : > { %v905_v19 = vpop.eup %904 }
 0x147   : > { %v606_v20 = vmul.f32 0.6931472, %v905_v19 }
 0x149   : > { %v607_v21 = vadd.f32 %v606_v20, %v594_v60 }
 0x14b   : > { %v632_v24 = vsub.f32 %v621_v22, %v607_v21 }
 0x14d   : > { %v633_v25 = vmul.f32 %v814_v23, %v632_v24 }
 0x14f   : > { %v635_v26 = vsel %vm634_vm10, %v633_v25, 0.0 }
 0x150   : > { %636 = vadd.xlane.f32.xlu0 %v635_v26 }
 0x1c3   : > { %v637_v27 = vpop.xlane.xlu0 %636 }
 0x1c4   : > { %v638_v28 = vrot.slane %v637_v27, 4 }
 0x1c6   : > { %v639_v29 = vadd.f32 %v638_v28, %v637_v27 }
 0x1c8   : > { %v640_v30 = vrot.slane %v639_v29, 2 }
 0x1ca   : > { %v641_v31 = vadd.f32 %v640_v30, %v639_v29 }
 0x1cc   : > { %v642_v32 = vrot.slane %v641_v31, 1 }
 0x1ce   : > { %v643_v33 = vadd.f32 %v642_v32, %v641_v31 }
 0x1d0   : > { %819 = vpush %v643_v33 }
 0x201   : > { %s820_s8 = spop %819 }
 0x202   : > { %v645_v35 = vstv %s820_s8 }
 0x203   : > { %v647_v36 = vadd.f32 %v646_v34, %v645_v35 }
 0x205   : > { %649 = vst.msk [vmem:[%s1121_s7] sm:$0x1] %vm648_vm11, %v647_v36 }
 0x206   : > { %933 = shalt.err (!%p930_p8)
}
 0x207   : > { %821 = dma.vmem_to_hbm [thread:$0]  (%p1080_p3), %s664_s30, 128, %s666_s18, %s651_s10  }
 0x208 PF: > { %p827_p10 = scmp.ge.s32.totalorder %s1000_s22, 2  ;;  %s677_s6 = sand.u32 1, %s972_s15  }
 0x209   : > { %s678_s7 = scalar_lea.sflag [#allocation3], %s677_s6 }
 0x20a   : > { %p824_p11 = pnand %p827_p10, %p1090_p9 }
 0x20c   : > { %p825_p12 = pneg %p824_p11 }
 0x20e   : > { %967 = dma.done.wait (%p825_p12), %s678_s7, 128  }
 0x20f   : > { %969 = vsyncadd (%p825_p12), %s678_s7, 4294967168  ;;  %s17_s22 = sadd.s32 1, %s1000_s22   ;;  %s1261_s15 = smov %s976_s16 }
 0x210   : > { %p14_p13 = scmp.ge.s32.totalorder %s17_s22, 6   ;;  %s1262_s16 = smov %s980_s17 }
 0x211   : > { %s1263_s17 = smov %s1098_s5  ;;  %s1264_s18 = smov %s992_s20 }
 0x212   : > { %s1265_s19 = smov %s996_s21  ;;  %s1266_s20 = smov %s1269_s25 }
 0x213   : > { %s1267_s21 = smov %s1273_s26  ;;  %16 = sbr.rel (!%p14_p13) target bundleno = 5 (0x5), region = 78 }
 0x218   :  { %684 = vsyncpa [#allocation3], 1 }
 0x219   :  { %686 = vsyncpa [#allocation3 + $0x1], 1 }

</bundles_post_ra>
